<compile_context>
chip_gen: v7x
topology: tpu7x:2x2x1
jax: 0.10.0
libtpu: 0.0.40
codegen_flags: <defaults>
</compile_context>

<pallas_src>
import functools

import jax
import jax.numpy as jnp
from jax import lax
from jax.experimental import pallas as pl
from jax.experimental.pallas import tpu as pltpu


_MASK_VALUE = -1e30  # large finite negative (f32 scores): no NaN even for padded rows


def _round_up(x, m):
    return (x + m - 1) // m * m


# ---------------------------------------------------------------------------
# 1) Flash-style causal attention (online softmax, no attention-matrix writeback)
# ---------------------------------------------------------------------------
def _flash_kernel(q_ref, k_ref, v_ref, o_ref, m_sc, l_sc, acc_sc, *,
                  block, q_axis, kv_axis):
    qi = pl.program_id(q_axis)
    ki = pl.program_id(kv_axis)

    @pl.when(ki == 0)
    def _init():
        m_sc[...] = jnp.full_like(m_sc, _MASK_VALUE)
        l_sc[...] = jnp.zeros_like(l_sc)
        acc_sc[...] = jnp.zeros_like(acc_sc)

    # Equal q/k tile sizes -> ki > qi is fully masked, ki == qi is the only masked tile.
    on_diag = ki == qi
    below_diag = ki < qi

    def _update(masked):
        q = q_ref[...]                      # softmax scale already folded into q weights
        k = k_ref[...]
        v = v_ref[...]
        # q @ k^T without materializing a transpose: contract the last dims directly.
        s = lax.dot_general(q, k, (((1,), (1,)), ((), ())),
                            preferred_element_type=jnp.float32)       # (T, T) f32
        if masked:  # only the diagonal tile pays for the iota + select
            row = qi * block + lax.broadcasted_iota(jnp.int32, s.shape, 0)
            col = ki * block + lax.broadcasted_iota(jnp.int32, s.shape, 1)
            s = jnp.where(col <= row, s, _MASK_VALUE)
        m_prev = m_sc[...]
        m_new = jnp.maximum(m_prev, jnp.max(s, axis=-1, keepdims=True))
        alpha = jnp.exp(m_prev - m_new)
        p = jnp.exp(s - m_new)
        l_sc[...] = alpha * l_sc[...] + jnp.sum(p, axis=-1, keepdims=True)
        # Probabilities cast back to the value dtype before the second MXU matmul.
        acc_sc[...] = alpha * acc_sc[...] + jnp.dot(
            p.astype(v.dtype), v, preferred_element_type=jnp.float32)
        m_sc[...] = m_new

    @pl.when(below_diag)
    def _no_mask():
        _update(masked=False)

    @pl.when(on_diag)
    def _with_mask():
        _update(masked=True)

    @pl.when(ki == pl.num_programs(kv_axis) - 1)
    def _finalize():
        o_ref[...] = (acc_sc[...] *
                      pl.reciprocal(l_sc[...], approx=True)).astype(o_ref.dtype)


def flash_causal_attention(q, k, v, num_heads, *, block=256):
    """Causal scaled-dot-product attention per head.

    q, k, v: (B, S, E) with E = num_heads * head_dim. The softmax 1/temperature scale
    must already be folded into q. Returns (B, S, E). The full (H, S, S) attention
    matrix is intentionally NOT produced: the encoder layer discards it.
    """
    B, S, E = q.shape
    H = num_heads
    D = E // H

    blk = min(block, _round_up(S, 8))
    Sp = _round_up(S, blk)
    if Sp != S:
        # Padded key positions sit at indices >= S; the causal mask (col <= row) already
        # excludes them for every real query row. Padded query rows are sliced off.
        pad = ((0, 0), (0, Sp - S), (0, 0))
        q, k, v = jnp.pad(q, pad), jnp.pad(k, pad), jnp.pad(v, pad)
    n_tiles = Sp // blk

    scratch = [
        pltpu.VMEM((blk, 1), jnp.float32),   # running row max (f32)
        pltpu.VMEM((blk, 1), jnp.float32),   # running softmax denom (f32)
        pltpu.VMEM((blk, D), jnp.float32),   # f32 output accumulator
    ]

    if D % 128 == 0:
        # Head-indexed BlockSpec: no head-major transposes through HBM, lane-dense output.
        kernel = functools.partial(_flash_kernel, block=blk, q_axis=2, kv_axis=3)
        q_map = lambda b, h, qi, ki: (b, qi, h)
        # Clamp to the diagonal: for ki > qi the block index equals the previous step's,
        # so the pipeline skips the DMA (compute is skipped by pl.when in the kernel).
        kv_map = lambda b, h, qi, ki: (b, jnp.minimum(ki, qi), h)
        out = pl.pallas_call(
            kernel,
            out_shape=jax.ShapeDtypeStruct((B, Sp, E), q.dtype),
            grid_spec=pltpu.PrefetchScalarGridSpec(
                num_scalar_prefetch=0,
                grid=(B, H, n_tiles, n_tiles),
                in_specs=[
                    pl.BlockSpec((None, blk, D), q_map),
                    pl.BlockSpec((None, blk, D), kv_map),
                    pl.BlockSpec((None, blk, D), kv_map),
                ],
                out_specs=pl.BlockSpec((None, blk, D), q_map),
                scratch_shapes=scratch,
            ),
            compiler_params=pltpu.CompilerParams(
                dimension_semantics=("parallel", "parallel", "parallel", "arbitrary")),
        )(q, k, v)
        return out[:, :S, :] if Sp != S else out

    # Fallback for lane-unaligned head dims (D % 128 != 0): head-major layout so the
    # block's last dim equals the full array dim (satisfies the (8,128) tiling rule).
    def to_heads(x):
        return x.reshape(B, Sp, H, D).transpose(0, 2, 1, 3).reshape(B * H, Sp, D)

    qh, kh, vh = to_heads(q), to_heads(k), to_heads(v)
    kernel = functools.partial(_flash_kernel, block=blk, q_axis=1, kv_axis=2)
    q_map = lambda bh, qi, ki: (bh, qi, 0)
    kv_map = lambda bh, qi, ki: (bh, jnp.minimum(ki, qi), 0)
    out = pl.pallas_call(
        kernel,
        out_shape=jax.ShapeDtypeStruct((B * H, Sp, D), q.dtype),
        grid_spec=pltpu.PrefetchScalarGridSpec(
            num_scalar_prefetch=0,
            grid=(B * H, n_tiles, n_tiles),
            in_specs=[
                pl.BlockSpec((None, blk, D), q_map),
                pl.BlockSpec((None, blk, D), kv_map),
                pl.BlockSpec((None, blk, D), kv_map),
            ],
            out_specs=pl.BlockSpec((None, blk, D), q_map),
            scratch_shapes=scratch,
        ),
        compiler_params=pltpu.CompilerParams(
            dimension_semantics=("parallel", "parallel", "arbitrary")),
    )(qh, kh, vh)
    out = out.reshape(B, H, Sp, D).transpose(0, 2, 1, 3).reshape(B, Sp, E)
    return out[:, :S, :] if Sp != S else out


# ---------------------------------------------------------------------------
# 2) Fused residual-add + LayerNorm
# ---------------------------------------------------------------------------
def _add_ln_kernel(x_ref, y_ref, g_ref, b_ref, o_ref, *, eps):
    x = x_ref[...].astype(jnp.float32) + y_ref[...].astype(jnp.float32)   # (TR, E)
    mu = jnp.mean(x, axis=-1, keepdims=True)
    xc = x - mu
    var = jnp.mean(xc * xc, axis=-1, keepdims=True)
    y = xc * lax.rsqrt(var + eps)
    o_ref[...] = (y * g_ref[...].astype(jnp.float32)
                  + b_ref[...].astype(jnp.float32)).astype(o_ref.dtype)


def add_layer_norm(x, y, gamma, beta, *, eps=1e-5, block_rows=512):
    """LayerNorm(x + y) over the last dim. x, y: (..., E); gamma, beta: (E,)."""
    orig_shape = x.shape
    E = orig_shape[-1]
    x2 = x.reshape(-1, E)
    y2 = y.reshape(-1, E)
    R = x2.shape[0]

    tr = min(block_rows, _round_up(R, 8))
    # Keep the double-buffered working set (x, y, out streams) well inside the default
    # scoped-VMEM limit -- v7x has only 64 MiB physical / 32 MiB default scoped VMEM.
    itemsize = jnp.dtype(x.dtype).itemsize
    while tr > 8 and tr * E * itemsize * 3 * 2 > 24 * 1024 * 1024:
        tr //= 2
    tr = max(_round_up(tr, 8), 8)

    Rp = _round_up(R, tr)
    if Rp != R:
        x2 = jnp.pad(x2, ((0, Rp - R), (0, 0)))
        y2 = jnp.pad(y2, ((0, Rp - R), (0, 0)))
    g2 = gamma.reshape(1, E)
    b2 = beta.reshape(1, E)

    out = pl.pallas_call(
        functools.partial(_add_ln_kernel, eps=float(eps)),
        out_shape=jax.ShapeDtypeStruct((Rp, E), x.dtype),
        grid_spec=pltpu.PrefetchScalarGridSpec(
            num_scalar_prefetch=0,
            grid=(Rp // tr,),
            in_specs=[
                pl.BlockSpec((tr, E), lambda i: (i, 0)),
                pl.BlockSpec((tr, E), lambda i: (i, 0)),
                pl.BlockSpec((1, E), lambda i: (0, 0)),
                pl.BlockSpec((1, E), lambda i: (0, 0)),
            ],
            out_specs=pl.BlockSpec((tr, E), lambda i: (i, 0)),
        ),
        compiler_params=pltpu.CompilerParams(dimension_semantics=("parallel",)),
    )(x2, y2, g2, b2)
    return out[:R].reshape(orig_shape)


# ---------------------------------------------------------------------------
# FactorizedLinear (two stacked low-rank GEMMs) -- left to XLA (tiny rank-r matmuls)
# ---------------------------------------------------------------------------
def factorized_linear(x, p):
    V, b0, U, b1 = p                      # V: (rank, in), U: (out, rank)
    h = jnp.dot(x, V.T) + b0
    return jnp.dot(h, U.T) + b1


# ---------------------------------------------------------------------------
# Full encoder-layer forward (Pallas attention + Pallas add+LayerNorm)
# ---------------------------------------------------------------------------
def encoder_layer_forward(params, src, eps=1e-5, attn_dtype=None):
    B, S, E = src.shape
    H = params["num_heads"]
    D = E // H
    inv_temp = 1.0 / (float(D) ** 0.5)

    # Fold the softmax 1/temperature into the q projection (zero runtime cost) instead
    # of a per-KV-tile multiply inside the attention kernel.
    Vq, b0q, Uq, b1q = params["linear_q"]
    q = factorized_linear(src, (Vq, b0q, Uq * inv_temp, b1q * inv_temp))
    k = factorized_linear(src, params["linear_k"])
    v = factorized_linear(src, params["linear_v"])

    if attn_dtype is not None:
        # e.g. jnp.bfloat16: halves attention HBM traffic; softmax state stays f32.
        q, k, v = q.astype(attn_dtype), k.astype(attn_dtype), v.astype(attn_dtype)

    attn = flash_causal_attention(q, k, v, H).astype(src.dtype)
    attn = factorized_linear(attn, params["linear_o"])

    # TODO(synk): dropout is eval-mode identity here; training-mode dropout would use
    # pltpu.prng_seed + pltpu.stateful_bernoulli inside the fused kernels.
    x = add_layer_norm(src, attn, params["norm1_g"], params["norm1_b"], eps=eps)

    h = factorized_linear(x, params["linear1"])
    h = jax.nn.gelu(h, approximate=False)           # nn.GELU() default = exact (erf) GELU
    h = factorized_linear(h, params["linear2"])
    return add_layer_norm(x, h, params["norm2_g"], params["norm2_b"], eps=eps)


# ---------------------------------------------------------------------------
# Pure-JAX reference (no Pallas) for verification
# ---------------------------------------------------------------------------
def reference_forward(params, src, eps=1e-5):
    B, S, E = src.shape
    H = params["num_heads"]
    D = E // H
    temperature = float(D) ** 0.5

    def ln(x, g, b):
        mu = jnp.mean(x, axis=-1, keepdims=True)
        var = jnp.mean((x - mu) ** 2, axis=-1, keepdims=True)
        return (x - mu) / jnp.sqrt(var + eps) * g + b

    def to_heads(x):
        return x.reshape(B, S, H, D).transpose(0, 2, 1, 3).reshape(B * H, S, D)

    q = to_heads(factorized_linear(src, params["linear_q"]))
    k = to_heads(factorized_linear(src, params["linear_k"]))
    v = to_heads(factorized_linear(src, params["linear_v"]))
    s = jnp.einsum("hqd,hkd->hqk", q, k) / temperature
    mask = jnp.tril(jnp.ones((S, S), dtype=bool))
    s = jnp.where(mask[None], s, -jnp.inf)
    a = jax.nn.softmax(s, axis=-1)
    o = jnp.einsum("hqk,hkd->hqd", a, v)
    o = o.reshape(B, H, S, D).transpose(0, 2, 1, 3).reshape(B, S, E)
    attn_out = factorized_linear(o, params["linear_o"])
    x = ln(src + attn_out, params["norm1_g"], params["norm1_b"])
    h = jax.nn.gelu(factorized_linear(x, params["linear1"]), approximate=False)
    h = factorized_linear(h, params["linear2"])
    return ln(x + h, params["norm2_g"], params["norm2_b"])


# ---------------------------------------------------------------------------
def _make_params(key, E, H, HIDDEN, ratio=0.2, scale=0.3, dtype=jnp.float32):
    def fac_init(k, in_dim, out_dim):
        rank = max(int(min(in_dim, out_dim) * ratio), 1)
        kV, kU, kb0, kb1 = jax.random.split(k, 4)
        V = (jax.random.normal(kV, (rank, in_dim)) * scale).astype(dtype)
        b0 = (jax.random.normal(kb0, (rank,)) * scale).astype(dtype)
        U = (jax.random.normal(kU, (out_dim, rank)) * scale).astype(dtype)
        b1 = (jax.random.normal(kb1, (out_dim,)) * scale).astype(dtype)
        return (V, b0, U, b1)

    keys = jax.random.split(key, 10)
    return {
        "num_heads": H,
        "linear_q": fac_init(keys[0], E, E),
        "linear_k": fac_init(keys[1], E, E),
        "linear_v": fac_init(keys[2], E, E),
        "linear_o": fac_init(keys[3], E, E),
        "linear1": fac_init(keys[4], E, HIDDEN),
        "linear2": fac_init(keys[5], HIDDEN, E),
        "norm1_g": (1.0 + 0.1 * jax.random.normal(keys[6], (E,))).astype(dtype),
        "norm1_b": (0.1 * jax.random.normal(keys[7], (E,))).astype(dtype),
        "norm2_g": (1.0 + 0.1 * jax.random.normal(keys[8], (E,))).astype(dtype),
        "norm2_b": (0.1 * jax.random.normal(keys[9], (E,))).astype(dtype),
    }


if __name__ == "__main__":
    root = jax.random.PRNGKey(0)

    # Config A: module-default small shape (head_dim=8 -> lane-unaligned fallback path).
    # Config B: head_dim=128 -> head-indexed BlockSpec path (+ seq padding 12 -> 16).
    configs = [
        dict(B=2, S=8, E=32, H=4, HIDDEN=64, scale=0.3),
        dict(B=2, S=12, E=256, H=2, HIDDEN=128, scale=0.1),
    ]

    for idx, cfg in enumerate(configs):
        kp, kx = jax.random.split(jax.random.fold_in(root, idx))
        params = _make_params(kp, cfg["E"], cfg["H"], cfg["HIDDEN"], scale=cfg["scale"])
        src = jax.random.normal(kx, (cfg["B"], cfg["S"], cfg["E"])).astype(jnp.float32)

        out = encoder_layer_forward(params, src)
        jax.block_until_ready(out)

        ref = reference_forward(params, src)
        assert out.shape == src.shape, f"bad output shape {out.shape}"
        max_diff = float(jnp.max(jnp.abs(out - ref)))
        assert jnp.allclose(out, ref, atol=5e-3, rtol=5e-3), (
            f"config {idx} mismatch, max|diff|={max_diff}")

    print("KERNEL_OK")
</pallas_src>

<mosaic_0001>
module attributes {stable_mosaic.version = 11 : i64} {
  func.func @_flash_kernel(%arg0: i32, %arg1: i32, %arg2: i32, %arg3: memref<1x8x8xf32, #tpu.memory_space<vmem>>, %arg4: memref<1x8x8xf32, #tpu.memory_space<vmem>>, %arg5: memref<1x8x8xf32, #tpu.memory_space<vmem>>, %arg6: memref<1x8x8xf32, #tpu.memory_space<vmem>>, %arg7: memref<8x1xf32, #tpu.memory_space<vmem>>, %arg8: memref<8x1xf32, #tpu.memory_space<vmem>>, %arg9: memref<8x8xf32, #tpu.memory_space<vmem>>) attributes {dimension_semantics = [#tpu.dimension_semantics<parallel>, #tpu.dimension_semantics<parallel>, #tpu.dimension_semantics<arbitrary>], iteration_bounds = array<i64: 8, 1, 1>, scalar_prefetch = 0 : i64, scratch_operands = 3 : i64, tpu.core_type = #tpu.core_type<tc>, window_params = [{transform_indices = @transform_0, window_bounds = array<i64: 1, 8, 8>}, {transform_indices = @transform_1, window_bounds = array<i64: 1, 8, 8>}, {transform_indices = @transform_2, window_bounds = array<i64: 1, 8, 8>}, {transform_indices = @transform_3, window_bounds = array<i64: 1, 8, 8>}]} {
    %c0_i32 = arith.constant 0 : i32
    %0 = arith.cmpi eq, %arg2, %c0_i32 : i32
    %1 = arith.extui %0 : i1 to i32
    %c0_i32_0 = arith.constant 0 : i32
    %2 = arith.cmpi ne, %1, %c0_i32_0 : i32
    scf.if %2 {
      %cst = arith.constant -1.000000e+30 : f32
      %12 = vector.broadcast %cst : f32 to vector<8x1xf32>
      %c0 = arith.constant 0 : index
      %c0_5 = arith.constant 0 : index
      %13 = vector.load %arg7[%c0, %c0_5] : memref<8x1xf32, #tpu.memory_space<vmem>>, vector<8x1xf32>
      tpu.vector_store %arg7[%c0, %c0_5], %12 {strides = array<i32>} : memref<8x1xf32, #tpu.memory_space<vmem>>, vector<8x1xf32>,
      %cst_6 = arith.constant 0.000000e+00 : f32
      %14 = vector.broadcast %cst_6 : f32 to vector<8x1xf32>
      %c0_7 = arith.constant 0 : index
      %c0_8 = arith.constant 0 : index
      %15 = vector.load %arg8[%c0_7, %c0_8] : memref<8x1xf32, #tpu.memory_space<vmem>>, vector<8x1xf32>
      tpu.vector_store %arg8[%c0_7, %c0_8], %14 {strides = array<i32>} : memref<8x1xf32, #tpu.memory_space<vmem>>, vector<8x1xf32>,
      %cst_9 = arith.constant 0.000000e+00 : f32
      %16 = vector.broadcast %cst_9 : f32 to vector<8x8xf32>
      %c0_10 = arith.constant 0 : index
      %c0_11 = arith.constant 0 : index
      %17 = vector.load %arg9[%c0_10, %c0_11] : memref<8x8xf32, #tpu.memory_space<vmem>>, vector<8x8xf32>
      tpu.vector_store %arg9[%c0_10, %c0_11], %16 {strides = array<i32>} : memref<8x8xf32, #tpu.memory_space<vmem>>, vector<8x8xf32>,
    } else {
    }
    %3 = arith.cmpi eq, %arg2, %arg1 : i32
    %4 = arith.cmpi slt, %arg2, %arg1 : i32
    %5 = arith.extui %4 : i1 to i32
    %c0_i32_1 = arith.constant 0 : i32
    %6 = arith.cmpi ne, %5, %c0_i32_1 : i32
    scf.if %6 {
      %c0 = arith.constant 0 : index
      %c0_5 = arith.constant 0 : index
      %c0_6 = arith.constant 0 : index
      %12 = vector.load %arg3[%c0, %c0_5, %c0_6] : memref<1x8x8xf32, #tpu.memory_space<vmem>>, vector<1x8x8xf32>
      %13 = vector.shape_cast %12 : vector<1x8x8xf32> to vector<8x8xf32>
      %c0_7 = arith.constant 0 : index
      %c0_8 = arith.constant 0 : index
      %c0_9 = arith.constant 0 : index
      %14 = vector.load %arg4[%c0_7, %c0_8, %c0_9] : memref<1x8x8xf32, #tpu.memory_space<vmem>>, vector<1x8x8xf32>
      %15 = vector.shape_cast %14 : vector<1x8x8xf32> to vector<8x8xf32>
      %c0_10 = arith.constant 0 : index
      %c0_11 = arith.constant 0 : index
      %c0_12 = arith.constant 0 : index
      %16 = vector.load %arg5[%c0_10, %c0_11, %c0_12] : memref<1x8x8xf32, #tpu.memory_space<vmem>>, vector<1x8x8xf32>
      %17 = vector.shape_cast %16 : vector<1x8x8xf32> to vector<8x8xf32>
      %cst = arith.constant dense<0.000000e+00> : vector<8x8xf32>
      %18 = tpu.matmul %13, %15, %cst {dimension_numbers = #tpu.dot_dimension_numbers<[1], [1], [0], [0], [0, 0, 1, 0], [], []>} : vector<8x8xf32>, vector<8x8xf32>, vector<8x8xf32> -> vector<8x8xf32>
      %c0_13 = arith.constant 0 : index
      %c0_14 = arith.constant 0 : index
      %19 = vector.load %arg7[%c0_13, %c0_14] : memref<8x1xf32, #tpu.memory_space<vmem>>, vector<8x1xf32>
      %cst_15 = arith.constant dense<0xFF800000> : vector<8xf32>
      %20 = vector.multi_reduction <maximumf>, %18, %cst_15 [1] : vector<8x8xf32> to vector<8xf32>
      %21 = vector.shape_cast %20 : vector<8xf32> to vector<8x1xf32>
      %22 = arith.maximumf %19, %21 : vector<8x1xf32>
      %23 = arith.subf %19, %22 : vector<8x1xf32>
      %24 = math.exp %23 : vector<8x1xf32>
      %25 = vector.broadcast %22 : vector<8x1xf32> to vector<8x8xf32>
      %26 = arith.subf %18, %25 : vector<8x8xf32>
      %27 = math.exp %26 : vector<8x8xf32>
      %c0_16 = arith.constant 0 : index
      %c0_17 = arith.constant 0 : index
      %28 = vector.load %arg8[%c0_16, %c0_17] : memref<8x1xf32, #tpu.memory_space<vmem>>, vector<8x1xf32>
      %29 = arith.mulf %24, %28 : vector<8x1xf32>
      %cst_18 = arith.constant dense<0.000000e+00> : vector<8xf32>
      %30 = vector.multi_reduction <add>, %27, %cst_18 [1] : vector<8x8xf32> to vector<8xf32>
      %31 = vector.shape_cast %30 : vector<8xf32> to vector<8x1xf32>
      %32 = arith.addf %29, %31 : vector<8x1xf32>
      %c0_19 = arith.constant 0 : index
      %c0_20 = arith.constant 0 : index
      %33 = vector.load %arg8[%c0_19, %c0_20] : memref<8x1xf32, #tpu.memory_space<vmem>>, vector<8x1xf32>
      tpu.vector_store %arg8[%c0_19, %c0_20], %32 {strides = array<i32>} : memref<8x1xf32, #tpu.memory_space<vmem>>, vector<8x1xf32>,
      %c0_21 = arith.constant 0 : index
      %c0_22 = arith.constant 0 : index
      %34 = vector.load %arg9[%c0_21, %c0_22] : memref<8x8xf32, #tpu.memory_space<vmem>>, vector<8x8xf32>
      %35 = vector.broadcast %24 : vector<8x1xf32> to vector<8x8xf32>
      %36 = arith.mulf %35, %34 : vector<8x8xf32>
      %cst_23 = arith.constant dense<0.000000e+00> : vector<8x8xf32>
      %37 = tpu.matmul %27, %17, %cst_23 {dimension_numbers = #tpu.dot_dimension_numbers<[1], [0], [0], [1], [0, 0, 1, 1], [], []>} : vector<8x8xf32>, vector<8x8xf32>, vector<8x8xf32> -> vector<8x8xf32>
      %38 = arith.addf %36, %37 : vector<8x8xf32>
      %c0_24 = arith.constant 0 : index
      %c0_25 = arith.constant 0 : index
      %39 = vector.load %arg9[%c0_24, %c0_25] : memref<8x8xf32, #tpu.memory_space<vmem>>, vector<8x8xf32>
      tpu.vector_store %arg9[%c0_24, %c0_25], %38 {strides = array<i32>} : memref<8x8xf32, #tpu.memory_space<vmem>>, vector<8x8xf32>,
      %c0_26 = arith.constant 0 : index
      %c0_27 = arith.constant 0 : index
      %40 = vector.load %arg7[%c0_26, %c0_27] : memref<8x1xf32, #tpu.memory_space<vmem>>, vector<8x1xf32>
      tpu.vector_store %arg7[%c0_26, %c0_27], %22 {strides = array<i32>} : memref<8x1xf32, #tpu.memory_space<vmem>>, vector<8x1xf32>,
    } else {
    }
    %7 = arith.extui %3 : i1 to i32
    %c0_i32_2 = arith.constant 0 : i32
    %8 = arith.cmpi ne, %7, %c0_i32_2 : i32
    scf.if %8 {
      %c0 = arith.constant 0 : index
      %c0_5 = arith.constant 0 : index
      %c0_6 = arith.constant 0 : index
      %12 = vector.load %arg3[%c0, %c0_5, %c0_6] : memref<1x8x8xf32, #tpu.memory_space<vmem>>, vector<1x8x8xf32>
      %13 = vector.shape_cast %12 : vector<1x8x8xf32> to vector<8x8xf32>
      %c0_7 = arith.constant 0 : index
      %c0_8 = arith.constant 0 : index
      %c0_9 = arith.constant 0 : index
      %14 = vector.load %arg4[%c0_7, %c0_8, %c0_9] : memref<1x8x8xf32, #tpu.memory_space<vmem>>, vector<1x8x8xf32>
      %15 = vector.shape_cast %14 : vector<1x8x8xf32> to vector<8x8xf32>
      %c0_10 = arith.constant 0 : index
      %c0_11 = arith.constant 0 : index
      %c0_12 = arith.constant 0 : index
      %16 = vector.load %arg5[%c0_10, %c0_11, %c0_12] : memref<1x8x8xf32, #tpu.memory_space<vmem>>, vector<1x8x8xf32>
      %17 = vector.shape_cast %16 : vector<1x8x8xf32> to vector<8x8xf32>
      %cst = arith.constant dense<0.000000e+00> : vector<8x8xf32>
      %18 = tpu.matmul %13, %15, %cst {dimension_numbers = #tpu.dot_dimension_numbers<[1], [1], [0], [0], [0, 0, 1, 0], [], []>} : vector<8x8xf32>, vector<8x8xf32>, vector<8x8xf32> -> vector<8x8xf32>
      %c8_i32 = arith.constant 8 : i32
      %19 = arith.muli %arg1, %c8_i32 : i32
      %20 = tpu.iota {dimensions = array<i32: 0>} : vector<8x8xi32>
      %21 = vector.broadcast %19 : i32 to vector<8x8xi32>
      %22 = arith.addi %21, %20 : vector<8x8xi32>
      %c8_i32_13 = arith.constant 8 : i32
      %23 = arith.muli %arg2, %c8_i32_13 : i32
      %24 = tpu.iota {dimensions = array<i32: 1>} : vector<8x8xi32>
      %25 = vector.broadcast %23 : i32 to vector<8x8xi32>
      %26 = arith.addi %25, %24 : vector<8x8xi32>
      %27 = arith.cmpi sle, %26, %22 : vector<8x8xi32>
      %cst_14 = arith.constant -1.000000e+30 : f32
      %28 = vector.broadcast %cst_14 : f32 to vector<8x8xf32>
      %29 = arith.select %27, %18, %28 : vector<8x8xi1>, vector<8x8xf32>
      %c0_15 = arith.constant 0 : index
      %c0_16 = arith.constant 0 : index
      %30 = vector.load %arg7[%c0_15, %c0_16] : memref<8x1xf32, #tpu.memory_space<vmem>>, vector<8x1xf32>
      %cst_17 = arith.constant dense<0xFF800000> : vector<8xf32>
      %31 = vector.multi_reduction <maximumf>, %29, %cst_17 [1] : vector<8x8xf32> to vector<8xf32>
      %32 = vector.shape_cast %31 : vector<8xf32> to vector<8x1xf32>
      %33 = arith.maximumf %30, %32 : vector<8x1xf32>
      %34 = arith.subf %30, %33 : vector<8x1xf32>
      %35 = math.exp %34 : vector<8x1xf32>
      %36 = vector.broadcast %33 : vector<8x1xf32> to vector<8x8xf32>
      %37 = arith.subf %29, %36 : vector<8x8xf32>
      %38 = math.exp %37 : vector<8x8xf32>
      %c0_18 = arith.constant 0 : index
      %c0_19 = arith.constant 0 : index
      %39 = vector.load %arg8[%c0_18, %c0_19] : memref<8x1xf32, #tpu.memory_space<vmem>>, vector<8x1xf32>
      %40 = arith.mulf %35, %39 : vector<8x1xf32>
      %cst_20 = arith.constant dense<0.000000e+00> : vector<8xf32>
      %41 = vector.multi_reduction <add>, %38, %cst_20 [1] : vector<8x8xf32> to vector<8xf32>
      %42 = vector.shape_cast %41 : vector<8xf32> to vector<8x1xf32>
      %43 = arith.addf %40, %42 : vector<8x1xf32>
      %c0_21 = arith.constant 0 : index
      %c0_22 = arith.constant 0 : index
      %44 = vector.load %arg8[%c0_21, %c0_22] : memref<8x1xf32, #tpu.memory_space<vmem>>, vector<8x1xf32>
      tpu.vector_store %arg8[%c0_21, %c0_22], %43 {strides = array<i32>} : memref<8x1xf32, #tpu.memory_space<vmem>>, vector<8x1xf32>,
      %c0_23 = arith.constant 0 : index
      %c0_24 = arith.constant 0 : index
      %45 = vector.load %arg9[%c0_23, %c0_24] : memref<8x8xf32, #tpu.memory_space<vmem>>, vector<8x8xf32>
      %46 = vector.broadcast %35 : vector<8x1xf32> to vector<8x8xf32>
      %47 = arith.mulf %46, %45 : vector<8x8xf32>
      %cst_25 = arith.constant dense<0.000000e+00> : vector<8x8xf32>
      %48 = tpu.matmul %38, %17, %cst_25 {dimension_numbers = #tpu.dot_dimension_numbers<[1], [0], [0], [1], [0, 0, 1, 1], [], []>} : vector<8x8xf32>, vector<8x8xf32>, vector<8x8xf32> -> vector<8x8xf32>
      %49 = arith.addf %47, %48 : vector<8x8xf32>
      %c0_26 = arith.constant 0 : index
      %c0_27 = arith.constant 0 : index
      %50 = vector.load %arg9[%c0_26, %c0_27] : memref<8x8xf32, #tpu.memory_space<vmem>>, vector<8x8xf32>
      tpu.vector_store %arg9[%c0_26, %c0_27], %49 {strides = array<i32>} : memref<8x8xf32, #tpu.memory_space<vmem>>, vector<8x8xf32>,
      %c0_28 = arith.constant 0 : index
      %c0_29 = arith.constant 0 : index
      %51 = vector.load %arg7[%c0_28, %c0_29] : memref<8x1xf32, #tpu.memory_space<vmem>>, vector<8x1xf32>
      tpu.vector_store %arg7[%c0_28, %c0_29], %33 {strides = array<i32>} : memref<8x1xf32, #tpu.memory_space<vmem>>, vector<8x1xf32>,
    } else {
    }
    %c0_i32_3 = arith.constant 0 : i32
    %9 = arith.cmpi eq, %arg2, %c0_i32_3 : i32
    %10 = arith.extui %9 : i1 to i32
    %c0_i32_4 = arith.constant 0 : i32
    %11 = arith.cmpi ne, %10, %c0_i32_4 : i32
    scf.if %11 {
      %c0 = arith.constant 0 : index
      %c0_5 = arith.constant 0 : index
      %12 = vector.load %arg9[%c0, %c0_5] : memref<8x8xf32, #tpu.memory_space<vmem>>, vector<8x8xf32>
      %c0_6 = arith.constant 0 : index
      %c0_7 = arith.constant 0 : index
      %13 = vector.load %arg8[%c0_6, %c0_7] : memref<8x1xf32, #tpu.memory_space<vmem>>, vector<8x1xf32>
      %14 = tpu.reciprocal %13 {approx = true} : vector<8x1xf32> -> vector<8x1xf32>
      %15 = vector.broadcast %14 : vector<8x1xf32> to vector<8x8xf32>
      %16 = arith.mulf %12, %15 : vector<8x8xf32>
      %c0_8 = arith.constant 0 : index
      %c0_9 = arith.constant 0 : index
      %c0_10 = arith.constant 0 : index
      %17 = vector.load %arg6[%c0_8, %c0_9, %c0_10] : memref<1x8x8xf32, #tpu.memory_space<vmem>>, vector<1x8x8xf32>
      %18 = vector.shape_cast %17 : vector<1x8x8xf32> to vector<8x8xf32>
      %19 = vector.shape_cast %16 : vector<8x8xf32> to vector<1x8x8xf32>
      tpu.vector_store %arg6[%c0_8, %c0_9, %c0_10], %19 {strides = array<i32>} : memref<1x8x8xf32, #tpu.memory_space<vmem>>, vector<1x8x8xf32>,
    } else {
    }
    return
  }
  func.func @transform_0(%arg0: i32, %arg1: i32, %arg2: i32) -> (i32, i32, i32) {
    %c0_i32 = arith.constant 0 : i32
    %c0_i32_0 = arith.constant 0 : i32
    return %arg0, %arg1, %c0_i32 : i32, i32, i32
  }
  func.func @transform_1(%arg0: i32, %arg1: i32, %arg2: i32) -> (i32, i32, i32) {
    %0 = arith.minsi %arg2, %arg1 : i32
    %c0_i32 = arith.constant 0 : i32
    %c0_i32_0 = arith.constant 0 : i32
    return %arg0, %0, %c0_i32 : i32, i32, i32
  }
  func.func @transform_2(%arg0: i32, %arg1: i32, %arg2: i32) -> (i32, i32, i32) {
    %0 = arith.minsi %arg2, %arg1 : i32
    %c0_i32 = arith.constant 0 : i32
    %c0_i32_0 = arith.constant 0 : i32
    return %arg0, %0, %c0_i32 : i32, i32, i32
  }
  func.func @transform_3(%arg0: i32, %arg1: i32, %arg2: i32) -> (i32, i32, i32) {
    %c0_i32 = arith.constant 0 : i32
    %c0_i32_0 = arith.constant 0 : i32
    return %arg0, %arg1, %c0_i32 : i32, i32, i32
  }
}

</mosaic_0001>

<bundles_post_ra>
// kernel: tpu_custom_call.1
= control target key start
LH: loop header
LB: loop body
LE: loop exit
PB: predicated region body
PF: predicated region fallthrough
CT: control target
= control target key end

     0   :  { %s1466_s0 = inlined_call_operand.hbm [shape: f32[8,8,8], index: 0, kind: input, shape index: {}]   ;;  %s1467_s1 = inlined_call_operand.hbm [shape: f32[8,8,8], index: 1, kind: input, shape index: {}]   ;;  %s1468_s2 = inlined_call_operand.hbm [shape: f32[8,8,8], index: 2, kind: input, shape index: {}]   ;;  %s1469_s3 = inlined_call_operand.hbm [shape: f32[8,8,8], index: 3, kind: output, shape index: {}]  }
   0x1   :  { %1475 = sst [smem:[#allocation18_spill]] %s1467_s1 }
   0x2   :  { %8 = vsyncpa [#allocation6], 0 }
   0x3   :  { %10 = vsyncpa [#allocation6 + $0x1], 0 }
   0x4   :  { %11 = vsyncpa [#allocation9], 0 }
   0x5   :  { %13 = vsyncpa [#allocation9 + $0x1], 0 }
   0x6   :  { %14 = vsyncpa [#allocation7], 0 }
   0x7   :  { %16 = vsyncpa [#allocation7 + $0x1], 0  ;;  %s1192_s12 = smov 0   ;;  %s1194_s13 = smov 0  }
   0x8   :  { %s1196_s14 = smov 0   ;;  %s1198_s15 = smov 0  }
   0x9   :  { %s1200_s16 = smov 0   ;;  %s1202_s17 = smov 0  }
   0xa LB: > { %1476 = sst [smem:[#allocation15_spill]] %s1158_s16  ;;  %s1223_s18 = sadd.s32 4294967295, %s1162_s17   ;;  %s1162_s17 = sphi %s1202_s17, %s22_s17   ;;  %s1158_s16 = sphi %s1200_s16, %s1496_s16   ;;  %s1154_s15 = sphi %s1198_s15, %s1495_s15   ;;  %s1150_s14 = sphi %s1196_s14, %s1499_s14   ;;  %s1146_s13 = sphi %s1194_s13, %s1498_s13   ;;  %s1142_s12 = sphi %s1192_s12, %s1497_s12  }
   0xb   : > { %s864_s19 = sadd.s32 4294967294, %s1162_s17   ;;  %s41_s20 = sadd.s32 1, %s1158_s16 }
   0xc   : > { %s50_s21 = sadd.s32 1, %s1150_s14  ;;  %p43_p0 = scmp.ge.s32.totalorder %s41_s20, 8 }
   0xd   : > { %p57_p1 = scmp.ne.s32.totalorder %s1150_s14, %s1146_s13  ;;  %p58_p2 = scmp.eq.s32.totalorder %s1162_s17, 0 }
   0xe   : > { %p63_p3 = scmp.ne.s32.totalorder %s1146_s13, %s1142_s12  ;;  %s1501_s20 = smov (%p43_p0, %s41_s20), 0 }
   0xf   : > { %1477 = sst [smem:[#allocation16_spill]] %s1501_s20  ;;  %p1235_p4 = por %p58_p2, %p57_p1 }
  0x10   : > { %p64_p5 = scmp.eq.s32.totalorder %s1223_s18, 0  ;;  %s45_s23 = ssub.s32 %s1158_s16, %s1501_s20 }
  0x11   : > { %p153_p6 = scmp.eq.s32.totalorder %s1223_s18, 7  ;;  %p48_p7 = scmp.eq.s32.totalorder %s45_s23, 0 }
  0x12   : > { %p1243_p8 = por %p64_p5, %p63_p3  ;;  %p159_p10 = scmp.eq.s32.totalorder %s864_s19, 7 }
  0x13   : > { %p1247_p9 = por %p153_p6, %p57_p1  ;;  %p924_p12 = scmp.lt.s32.totalorder %s1162_s17, 8 }
  0x14   : > { %s1479_s24 = scalar_select %p1243_p8, 1, 0 }
  0x15   : > { %s1480_s25 = scalar_select %p1247_p9, 1, 0 }
  0x16   : > { %s1252_s26 = scalar_select %p48_p7, %s1150_s14, %s50_s21  }
  0x17   : > { %p1254_p11 = por %p159_p10, %p63_p3  ;;  %s179_s28 = sand.u32 1, %s1150_s14  }
  0x18   : > { %1481 = sst [smem:[#allocation17_spill]] %s1252_s26  ;;  %s1262_s29 = sshll.u32 %s179_s28, 3 }
  0x19   : > { %s1482_s27 = scalar_select %p1254_p11, 1, 0 }
  0x1a   : > { %s1265_s30 = sshll.u32 %s1158_s16, 7  ;;  %p1269_p13 = pnand %p924_p12, %p1235_p4 }
  0x1b   : > { %s198_s5 = sand.u32 1, %s1162_s17   ;;  %s1484_s1 = sld [smem:[#allocation18_spill]] }
  0x1c   : > { %s1483_s4 = scalar_select %p1269_p13, 1, 0 }
  0x1d   : > { %s202_s9 = scalar_lea.vmem [#allocation8], %s1262_s29  ;;  %s1285_s11 = scalar_lea.sflag [#allocation9], %s198_s5 }
  0x1e   : > { %s212_s10 = sshll.u32 %s202_s9, 4  ;;  %p1291_p3 = pneg %p1269_p13  ;;  %s1282_s10 = int_to_ptr.vmem [resolvable:$true] %s212_s10 }
  0x21   : > { %s1278_s8 = scalar_lea.hbm %s1484_s1, %s1265_s30  ;;  %s991_s6 = scalar_lea.hbm %s1484_s1, 1024 }
  0x22   : > { %s986_s19 = scalar_lea.hbm %s1278_s8, 128  ;;  %p992_p6 = scmp.lt.u32.totalorder %s1278_s8, %s1484_s1 }
  0x23   : > { %p987_p2 = scmp.ne.s32.totalorder %s1278_s8, %s986_s19  ;;  %p993_p7 = scmp.lt.u32.totalorder %s991_s6, %s986_s19 }
  0x24   : > { %p995_p12 = scmp.lt.u32.totalorder %s986_s19, %s1278_s8 }
  0x25   : > { %p989_p4 = pnand %p1291_p3, %p987_p2  ;;  %p994_p10 = por %p993_p7, %p992_p6 }
  0x27   : > { %p990_p5 = pneg %p989_p4  ;;  %p996_p0 = por %p995_p12, %p994_p10 }
  0x29   : > { %p997_p1 = pnand %p996_p0, %p990_p5 }
  0x2b   : > { %1000 = shalt.err (!%p997_p1)
}
  0x2c   : > { %s1001_s5 = scalar_lea.vmem %s1282_s10, 128  ;;  %s1164_s22 = smov [#allocation8]  }
  0x2d   : > { %p1002_p2 = scmp.ne.s32.totalorder %s1282_s10, %s1001_s5  ;;  %s1006_s23 = sshll.u32 %s1164_s22, 4  ;;  %s1007_s23 = int_to_ptr.vmem [resolvable:$false] %s1006_s23 }
  0x2e   : > { %s1008_s7 = scalar_lea.vmem %s1007_s23, 256  ;;  %p1009_p9 = scmp.lt.s32.totalorder %s1282_s10, %s1007_s23 }
  0x2f   : > { %p1004_p4 = pnand %p1002_p2, %p1291_p3  ;;  %p1010_p8 = scmp.lt.s32.totalorder %s1008_s7, %s1001_s5 }
  0x31   : > { %p1005_p11 = pneg %p1004_p4  ;;  %p1011_p6 = por %p1010_p8, %p1009_p9 }
  0x33   : > { %p1012_p7 = pnand %p1011_p6, %p1005_p11 }
  0x35   : > { %1015 = shalt.err (!%p1012_p7)
}
  0x36   : > { %916 = dma.hbm_to_vmem [thread:$0]  (!%p1269_p13), %s1278_s8, 128, %s1282_s10, %s1285_s11  }
  0x37   : > { %p1486_p0 = scmp.lt.s32.totalorder %s1162_s17, 9  ;;  %p1487_p1 = scmp.ge.s32.totalorder %s1162_s17, 1 }
  0x38   : > { %s1327_s5 = scalar_lea.hbm %s1466_s0, %s1265_s30  ;;  %s183_s22 = scalar_lea.vmem [#allocation5], %s1262_s29 }
  0x39   : > { %p1319_p5 = pnand %p1487_p1, %p1486_p0  ;;  %s191_s23 = sshll.u32 %s183_s22, 4  ;;  %s1330_s23 = int_to_ptr.vmem [resolvable:$true] %s191_s23 }
  0x3a   : > { %s1336_s7 = scalar_lea.hbm %s1468_s2, %s1265_s30  ;;  %s180_s1 = scalar_lea.sflag [#allocation6], %s179_s28 }
  0x3b   : > { %s1488_s19 = scalar_select %p1319_p5, 1, 0 }
  0x3c   : > { %s1016_s20 = scalar_lea.hbm %s1327_s5, 128  ;;  %s1021_s16 = scalar_lea.hbm %s1466_s0, 1024 }
  0x3d   : > { %p1017_p8 = scmp.ne.s32.totalorder %s1327_s5, %s1016_s20  ;;  %p1022_p10 = scmp.lt.u32.totalorder %s1327_s5, %s1466_s0 }
  0x3e   : > { %p1023_p12 = scmp.lt.u32.totalorder %s1021_s16, %s1016_s20  ;;  %p1025_p4 = scmp.lt.u32.totalorder %s1016_s20, %s1327_s5 }
  0x3f   : > { %p1019_p9 = pnand %p1017_p8, %p1291_p3 }
  0x40   : > { %p1024_p2 = por %p1023_p12, %p1022_p10 }
  0x41   : > { %p1020_p11 = pneg %p1019_p9 }
  0x42   : > { %p1026_p6 = por %p1025_p4, %p1024_p2 }
  0x44   : > { %p1027_p7 = pnand %p1026_p6, %p1020_p11 }
  0x46   : > { %1030 = shalt.err (!%p1027_p7)
}
  0x47   : > { %s1031_s28 = scalar_lea.vmem %s1330_s23, 128  ;;  %s1165_s30 = smov [#allocation5]  }
  0x48   : > { %p1032_p0 = scmp.ne.s32.totalorder %s1330_s23, %s1031_s28  ;;  %s1036_s8 = sshll.u32 %s1165_s30, 4  ;;  %s1037_s8 = int_to_ptr.vmem [resolvable:$false] %s1036_s8 }
  0x49   : > { %s1038_s26 = scalar_lea.vmem %s1037_s8, 256  ;;  %p1039_p9 = scmp.lt.s32.totalorder %s1330_s23, %s1037_s8 }
  0x4a   : > { %p1034_p1 = pnand %p1032_p0, %p1291_p3  ;;  %p1040_p5 = scmp.lt.s32.totalorder %s1038_s26, %s1031_s28 }
  0x4c   : > { %p1035_p8 = pneg %p1034_p1  ;;  %p1041_p10 = por %p1040_p5, %p1039_p9 }
  0x4e   : > { %p1042_p12 = pnand %p1041_p10, %p1035_p8 }
  0x50   : > { %1045 = shalt.err (!%p1042_p12)
}
  0x51   : > { %913 = dma.hbm_to_vmem [thread:$0]  (!%p1269_p13), %s1327_s5, 128, %s1330_s23, %s180_s1  }
  0x52   : > { %s223_s16 = scalar_lea.vmem [#allocation10], %s1262_s29  ;;  %s1046_s10 = scalar_lea.hbm %s1336_s7, 128 }
  0x53   : > { %s233_s20 = sshll.u32 %s223_s16, 4  ;;  %p1047_p11 = scmp.ne.s32.totalorder %s1336_s7, %s1046_s10  ;;  %s234_s20 = int_to_ptr.vmem [resolvable:$true] %s233_s20 }
  0x54   : > { %s1051_s22 = scalar_lea.hbm %s1468_s2, 1024  ;;  %p1052_p4 = scmp.lt.u32.totalorder %s1336_s7, %s1468_s2 }
  0x55   : > { %p1049_p5 = pnand %p1047_p11, %p1291_p3  ;;  %p1053_p6 = scmp.lt.u32.totalorder %s1051_s22, %s1046_s10 }
  0x56   : > { %p1055_p0 = scmp.lt.u32.totalorder %s1046_s10, %s1336_s7 }
  0x57   : > { %p1050_p2 = pneg %p1049_p5  ;;  %p1054_p7 = por %p1053_p6, %p1052_p4 }
  0x59   : > { %p1056_p1 = por %p1055_p0, %p1054_p7 }
  0x5b   : > { %p1057_p8 = pnand %p1056_p1, %p1050_p2 }
  0x5d   : > { %1060 = shalt.err (!%p1057_p8)
}
  0x5e   : > { %s1061_s1 = scalar_lea.vmem %s234_s20, 128  ;;  %s1166_s29 = smov [#allocation10]  }
  0x5f   : > { %p1062_p9 = scmp.ne.s32.totalorder %s234_s20, %s1061_s1  ;;  %s1066_s5 = sshll.u32 %s1166_s29, 4  ;;  %s1067_s5 = int_to_ptr.vmem [resolvable:$false] %s1066_s5 }
  0x60   : > { %s1068_s23 = scalar_lea.vmem %s1067_s5, 256  ;;  %p1069_p11 = scmp.lt.s32.totalorder %s234_s20, %s1067_s5 }
  0x61   : > { %p1064_p10 = pnand %p1062_p9, %p1291_p3  ;;  %p1070_p5 = scmp.lt.s32.totalorder %s1068_s23, %s1061_s1 }
  0x63   : > { %p1065_p12 = pneg %p1064_p10  ;;  %p1071_p13 = por %p1070_p5, %p1069_p11 }
  0x65   : > { %p1072_p4 = pnand %p1071_p13, %p1065_p12 }
  0x67   : > { %1075 = shalt.err (!%p1072_p4)
}
  0x68   : > { %p1489_p6 = scmp.ne.s32.totalorder %s1483_s4, 0  ;;  %p1490_p2 = scmp.ne.s32.totalorder %s1488_s19, 0 }
  0x69   : > { %s1383_s21 = sand.u32 (!%p1490_p2), 1, %s1146_s13   ;;  %p1491_p13 = scmp.ne.s32.totalorder (!%p1490_p2), %s1479_s24, 0 }
  0x6a   : > { %919 = dma.hbm_to_vmem [thread:$0]  (!%p1489_p6), %s1336_s7, 128, %s234_s20, %s1285_s11  }
  0x6b   : > { %242 = sbr.rel (%p1490_p2) target bundleno = 933 (0x3a5), region = 32  ;;  %s1386_s8 = sshll.u32 (!%p1490_p2), %s1383_s21, 3 }
  0x6c   : > { %s245_s26 = scalar_lea.sflag (!%p1490_p2), [#allocation6], %s1383_s21  ;;  %s248_s16 = scalar_lea.vmem (!%p1490_p2), [#allocation5], %s1386_s8 }
  0x72   : > { %1129 = dma.done.wait (%p1491_p13), %s245_s26, 128  }
  0x73   : > { %1131 = vsyncadd (%p1491_p13), %s245_s26, 4294967168  ;;  %s253_s4 = sand.u32 1, %s1223_s18   ;;  %s257_s19 = scalar_lea.vmem [#allocation8], %s1386_s8 }
  0x74   : > { %s254_s11 = scalar_lea.sflag [#allocation9], %s253_s4 }
  0x75   : > { %1133 = dma.done.wait (%p1491_p13), %s254_s11, 256  }
  0x76   : > { %1135 = vsyncadd (%p1491_p13), %s254_s11, 4294967040  ;;  %vm310_vm0 = vcmask 64512   ;;  %v1167_v0 = vmov 0.0   ;;  %vm1168_vm1 = vmmov 0   ;;  %v508_v1 = vld [vmem:[%s257_s19] sm:$0xff]  ;;  %v507_v2 = vld [vmem:[%s248_s16] sm:$0xff]  ;;  %v588_v4 = vlaneseq }
  0x77   : > { %892 = vmatprep.subr.mxu0 %v1167_v0  ;;  %311 = vst.msk [vmem:[#allocation4] sm:$0xff] %vm310_vm0, %v1167_v0  ;;  %894 = vmatprep.mubr.msk.f32.mxu0 %vm1168_vm1, %v1167_v0  ;;  %vm307_vm2 = vcmask 7168   ;;  %v1169_v3 = vmov -1e+30   ;;  %v1170_v11 = vmov 0   ;;  %s266_s18 = scalar_lea.vmem [#allocation10], %s1386_s8 }
  0x78   : > { %897 = vmatprep.subr.mxu1 %v1167_v0  ;;  %899 = vmatprep.mubr.msk.f32.mxu1 %vm1168_vm1, %v1167_v0  ;;  %308 = vst.msk [vmem:[#allocation2] sm:$0xff] %vm307_vm2, %v1169_v3  ;;  %309 = vst.msk [vmem:[#allocation3] sm:$0xff] %vm307_vm2, %v1167_v0  ;;  %v589_v5 = vshrl.u32 %v588_v4, 7  ;;  %v594_v6 = vand.u32 127, %v588_v4  ;;  %v509_v16 = vld [vmem:[%s266_s18] sm:$0xff]  ;;  %s885_s24 = sshll.u32 %s1154_s15, 7 }
  0x79   : > { %893 = vmatpush3.xpose.msk.msra.mxu0 %vm310_vm0, %v508_v1  ;;  %978 = vset.pattern.permute.xlu0 %v1170_v11  ;;  %s298_s7 = scalar_lea.vmem [#allocation11], %s1386_s8  ;;  %s1417_s9 = scalar_lea.hbm %s1469_s3, %s885_s24 }
  0x7a   : > { %vm597_vm3 = vcmp.le.s32.totalorder %v594_v6, %v589_v5  ;;  %979 = vset.pattern.permute.xlu1 %v1170_v11  ;;  %898 = vmatpush3.msra.mxu1 %v509_v16  ;;  %s735_s20 = sshll.u32 %s298_s7, 4  ;;  %s721_s22 = scalar_lea.sflag [#allocation7], %s1383_s21  ;;  %s1419_s20 = int_to_ptr.vmem [resolvable:$true] %s735_s20 }
  0x7b   : > { %s1076_s28 = scalar_lea.vmem %s1419_s20, 128  ;;  %p1492_p7 = scmp.ne.s32.totalorder %s1480_s25, 0 }
  0x7c   : > { %895 = vmatmul.mubr.msk.f32.vlgmr.msra.gmra.mrb[0].mxu0 %vm310_vm0, %v507_v2  ;;  %p1077_p3 = scmp.ne.s32.totalorder %s1419_s20, %s1076_s28  ;;  %s1171_s15 = smov [#allocation11]  }
  0x7d   : > { %s1080_s30 = sshll.u32 %s1171_s15, 4  ;;  %s1081_s30 = int_to_ptr.vmem [resolvable:$false] %s1080_s30 }
  0x7e   : > { %v623_v30 = vld [vmem:[#allocation4] sm:$0xff]  ;;  %p1078_p0 = pnand %p1077_p3, %p1492_p7  ;;  %s1082_s1 = scalar_lea.vmem %s1081_s30, 256 }
  0x7f   : > { %v599_v12 = vld [vmem:[#allocation2] sm:$0xff]  ;;  %v615_v24 = vld [vmem:[#allocation3] sm:$0xff]  ;;  %p1083_p8 = scmp.lt.s32.totalorder %s1419_s20, %s1081_s30  ;;  %p1084_p9 = scmp.lt.s32.totalorder %s1082_s1, %s1076_s28 }
  0x80   : > { %p1079_p1 = pneg %p1078_p0 }
  0x81   : > { %p1085_p10 = por %p1084_p9, %p1083_p8 }
  0x83   : > { %p1086_p12 = pnand %p1085_p10, %p1079_p1 }
 0x14f   : > { %v583_v7 = vpop.f32.mrb[0].mxu0 }
 0x150   : > { %v598_v8 = vsel %vm597_vm3, %v583_v7, -1e+30  ;;  %v896_v9 = vpop.f32.mrb[1].mxu0 }
 0x151   : > { %v600_v10 = vsel %vm310_vm0, %v598_v8, -inf }
 0x152   : > { %601 = vmax.xlane.f32.xlu0 %v600_v10 }
 0x1df   : > { %v602_v13 = vpop.xlane.xlu0 %601 }
 0x1e0   : > { %v603_v14 = vmax.f32 %v599_v12, %v602_v13 }
 0x1e2   : > { %v604_v15 = vsub.f32 %v599_v12, %v603_v14  ;;  %705 = vst.msk [vmem:[#allocation2] sm:$0xff] %vm307_vm2, %v603_v14  ;;  %609 = vperm.xlu0 %978, %v603_v14  }
 0x1e4   : > { %v605_v22 = vmul.f32 1.442695, %v604_v15 }
 0x261   : > { %v610_v17 = vpop.permute.xlu0 %609 }
 0x262   : > { %v612_v18 = vsub.f32 %v598_v8, %v610_v17 }
 0x264   : > { %v613_v19 = vmul.f32 1.442695, %v612_v18 }
 0x266   : > { %980 = vpow2.f32 %v613_v19 }
 0x267   : > { %982 = vpow2.f32 %v605_v22 }
 0x270   : > { %v981_v20 = vpop.eup %980 }
 0x271   : > { %900 = vmatmul.mubr.msk.f32.vlgmr.msra.gmra.mrb[0].mxu1 %vm310_vm0, %v981_v20  ;;  %v617_v21 = vsel %vm310_vm0, %v981_v20, 0.0  ;;  %v983_v23 = vpop.eup %982 }
 0x272   : > { %618 = vadd.xlane.f32.xlu1 %v617_v21  ;;  %v616_v25 = vmul.f32 %v983_v23, %v615_v24 }
 0x283   : > { %626 = vperm.xlu1 %979, %v983_v23  }
 0x2ff   : > { %v619_v26 = vpop.xlane.xlu1 %618 }
 0x300   : > { %v620_v27 = vadd.f32 %v619_v26, %v616_v25 }
 0x302   : > { %622 = vst.msk [vmem:[#allocation3] sm:$0xff] %vm307_vm2, %v620_v27 }
 0x303   : > { %v627_v31 = vpop.permute.xlu1 %626 }
 0x304   : > { %v629_v32 = vmul.f32 %v627_v31, %v623_v30 }
 0x309   : > { %v710_v28 = vld [vmem:[#allocation3] sm:$0xff] }
 0x30a   : > { %984 = vrcp.f32 %v710_v28 }
 0x314   : > { %v985_v29 = vpop.eup %984 }
 0x315   : > { %714 = vperm.xlu1 %979, %v985_v29  }
 0x344   : > { %v699_v33 = vpop.f32.mrb[0].mxu1 }
 0x345   : > { %v703_v34 = vadd.f32 %v699_v33, %v629_v32  ;;  %v901_v35 = vpop.f32.mrb[1].mxu1 }
 0x347   : > { %704 = vst.msk [vmem:[#allocation4] sm:$0xff] %vm310_vm0, %v703_v34 }
 0x34e   : > { %v709_v36 = vld [vmem:[#allocation4] sm:$0xff] }
 0x394   : > { %v715_v37 = vpop.permute.xlu1 %714 }
 0x395   : > { %v717_v38 = vmul.f32 %v715_v37, %v709_v36 }
 0x397   : > { %719 = vst.msk [vmem:[%s298_s7] sm:$0xff] %vm310_vm0, %v717_v38 }
 0x398   : > { %1089 = shalt.err (!%p1086_p12)
}
 0x399   : > { %s1090_s29 = scalar_lea.hbm %s1417_s9, 128  ;;  %s1094_s21 = scalar_lea.hbm %s1469_s3, 1024 }
 0x39a   : > { %p1091_p11 = scmp.ne.s32.totalorder %s1417_s9, %s1090_s29  ;;  %p1095_p6 = scmp.lt.u32.totalorder %s1417_s9, %s1469_s3 }
 0x39b   : > { %p1096_p2 = scmp.lt.u32.totalorder %s1094_s21, %s1090_s29  ;;  %p1098_p3 = scmp.lt.u32.totalorder %s1090_s29, %s1417_s9 }
 0x39c   : > { %p1092_p5 = pnand %p1091_p11, %p1492_p7 }
 0x39d   : > { %p1097_p13 = por %p1096_p2, %p1095_p6 }
 0x39e   : > { %p1093_p4 = pneg %p1092_p5 }
 0x39f   : > { %p1099_p0 = por %p1098_p3, %p1097_p13 }
 0x3a1   : > { %p1100_p1 = pnand %p1099_p0, %p1093_p4 }
 0x3a3   : > { %1103 = shalt.err (!%p1100_p1)
}
 0x3a4   : > { %908 = dma.vmem_to_hbm [thread:$0]  (%p1492_p7), %s1419_s20, 128, %s1417_s9, %s721_s22  }
 0x3a5 PF: > { %p925_p8 = scmp.ge.s32.totalorder %s1162_s17, 2  ;;  %s747_s16 = sand.u32 1, %s1142_s12  }
 0x3a6   : > { %p1493_p9 = scmp.ne.s32.totalorder %s1482_s27, 0  ;;  %s748_s4 = scalar_lea.sflag [#allocation7], %s747_s16 }
 0x3a8   : > { %p921_p10 = pnand %p925_p8, %p1493_p9 }
 0x3aa   : > { %1137 = dma.done.wait (!%p921_p10), %s748_s4, 128  }
 0x3ab   : > { %1139 = vsyncadd (!%p921_p10), %s748_s4, 4294967168  ;;  %s22_s17 = sadd.s32 1, %s1162_s17   ;;  %s1494_s25 = sld [smem:[#allocation17_spill]] }
 0x3ac   : > { %p19_p12 = scmp.ge.s32.totalorder %s22_s17, 10   ;;  %s1495_s15 = sld [smem:[#allocation15_spill]] }
 0x3ad   : > { %s1496_s16 = sld [smem:[#allocation16_spill]]  ;;  %s1497_s12 = smov %s1146_s13 }
 0x3ae   : > { %s1498_s13 = smov %s1150_s14  ;;  %21 = sbr.rel (!%p19_p12) target bundleno = 10 (0xa), region = 117 }
 0x3b1   : > { %s1499_s14 = smov %s1494_s25 }
 0x3b5   :  { %753 = vsyncpa [#allocation6], 1 }
 0x3b6   :  { %755 = vsyncpa [#allocation6 + $0x1], 1 }
 0x3b7   :  { %756 = vsyncpa [#allocation9], 1 }
 0x3b8   :  { %758 = vsyncpa [#allocation9 + $0x1], 1 }
 0x3b9   :  { %759 = vsyncpa [#allocation7], 1 }
 0x3ba   :  { %761 = vsyncpa [#allocation7 + $0x1], 1 }

</bundles_post_ra>
